<compile_context>
chip_gen: v5e
topology: v5e:2x2
jax: 0.10.0
libtpu: 0.0.40
codegen_flags: <defaults>
</compile_context>

<pallas_src>
import jax
import jax.numpy as jnp
from jax.experimental import pallas as pl
from jax.experimental.pallas import tpu as pltpu

BERT_DIM = 768   # bert-base-uncased hidden size (fixed by the module)
SEQ_LEN = 64     # tokenizer max_length in the module
HIDDEN = 128     # hidden_dim for the demo (module default 768; any multiple of 128 works)
_BM_MAX = 1024   # max rows per batch tile (amortizes grid-step overhead, VMEM-safe everywhere)


def _round_up(n, m):
    return ((n + m - 1) // m) * m


def _cdiv(a, b):
    return (a + b - 1) // b


def _text_head_kernel(x_ref, w1_ref, b1_ref, w2_ref, b2_ref, w3_ref, b3_ref, o_ref):
    # x_ref holds the CLS-token features of each batch row (the BlockSpec only DMAs the
    # first 768 lanes of the flattened [S*768] row).  Cast to bf16 on the VPU.
    x = x_ref[...].astype(jnp.bfloat16)
    # projection: Linear(768 -> H) + ReLU          (bf16 operands, f32 MXU accumulation)
    h = jnp.dot(x, w1_ref[...], preferred_element_type=jnp.float32)
    h = jnp.maximum(h + b1_ref[...], 0.0)
    # conditioning_augmentation layer 1: Linear(H -> 2H) + ReLU.  Keep h in f32 and
    # up-cast the tiny VMEM-resident weights so bf16 rounding does not compound.
    g = jnp.dot(h, w2_ref[...].astype(jnp.float32), preferred_element_type=jnp.float32)
    g = jnp.maximum(g + b2_ref[...], 0.0)
    # conditioning_augmentation layer 2: Linear(2H -> H)
    y = jnp.dot(g, w3_ref[...].astype(jnp.float32), preferred_element_type=jnp.float32)
    o_ref[...] = (y + b3_ref[...]).astype(o_ref.dtype)


@jax.jit
def text_encoder_forward(word_embeddings, params):
    """Mirrors TextEncoder.forward given precomputed BERT last_hidden_state.

    Args:
      word_embeddings: [B, S, 768] float32 (stands in for bert(...)["last_hidden_state"])
      params: dict with bf16 weights "w1"/"w2"/"w3" and f32 biases "b1"/"b2"/"b3".

    Returns:
      {'sentence_embedding': [B, H] f32, 'word_embeddings': [B, S, 768]}
    """
    B, S, D = word_embeddings.shape
    H = params["w1"].shape[1]

    # Free, metadata-only reshape: CLS features are lanes [0, D) of each flattened row.
    x2d = word_embeddings.reshape(B, S * D)

    # Batch tiling: tile count derived from B (bounds tail waste to <16 rows/tile),
    # >=2 tiles for nontrivial B so v7x's two TensorCores both get work, rows rounded to
    # 16 (sublane-dense bf16 loads), capped at _BM_MAX.  A single tile uses bm == B
    # exactly (full-dim block, always legal); multi-tile ragged tails are masked by
    # Pallas boundary handling, so no padding copies are made.
    num_tiles = max(_cdiv(B, _BM_MAX), 2 if B > 16 else 1)
    bm = min(_round_up(_cdiv(B, num_tiles), 16), _BM_MAX)
    if bm >= B:
        bm = B
    grid_m = _cdiv(B, bm)

    matmul_elems = D * H + H * 2 * H + 2 * H * H
    rows = grid_m * bm  # includes masked tail rows of the last tile
    cost = pl.CostEstimate(
        flops=2 * rows * matmul_elems,
        transcendentals=0,
        bytes_accessed=(rows * D * 4          # CLS rows of x (f32, strided DMA)
                        + matmul_elems * 2    # bf16 weights (fetched once, VMEM-resident)
                        + 4 * H * 4           # biases (f32)
                        + rows * H * 4),      # output (f32)
    )

    # Weight/bias index_maps return the same block every grid step -> DMA'd once and kept
    # VMEM-resident while batch tiles stream.
    # TODO(synk): single-buffer the resident weight specs (pipeline_mode=pl.Buffered(1))
    # to shave ~350 KiB of VMEM on v7x, and add cross-call weight residency (P10) if this
    # head runs every inference step.
    # TODO(synk): on v5e/v6e w1 could be stored int8 for the native int8 MXU path; not a
    # drop-in on v7x (fp8-only MXU), so portable bf16 is kept.
    out = pl.pallas_call(
        _text_head_kernel,
        out_shape=jax.ShapeDtypeStruct((B, H), jnp.float32),
        grid=(grid_m,),
        in_specs=[
            pl.BlockSpec((bm, D), lambda i: (i, 0)),       # CLS lanes of flattened rows
            pl.BlockSpec((D, H), lambda i: (0, 0)),
            pl.BlockSpec((1, H), lambda i: (0, 0)),
            pl.BlockSpec((H, 2 * H), lambda i: (0, 0)),
            pl.BlockSpec((1, 2 * H), lambda i: (0, 0)),
            pl.BlockSpec((2 * H, H), lambda i: (0, 0)),
            pl.BlockSpec((1, H), lambda i: (0, 0)),
        ],
        out_specs=pl.BlockSpec((bm, H), lambda i: (i, 0)),
        compiler_params=pltpu.CompilerParams(dimension_semantics=("parallel",)),
        cost_estimate=cost,
    )(
        x2d,
        params["w1"], params["b1"],
        params["w2"], params["b2"],
        params["w3"], params["b3"],
    )
    return {"sentence_embedding": out, "word_embeddings": word_embeddings}


def _init_linear(key, fan_in, fan_out):
    """Deterministic nn.Linear-style init; weight stored as [in, out] (x @ W + b)."""
    kw, kb = jax.random.split(key)
    bound = 1.0 / (fan_in ** 0.5)
    w = jax.random.uniform(kw, (fan_in, fan_out), jnp.float32, -bound, bound)
    b = jax.random.uniform(kb, (1, fan_out), jnp.float32, -bound, bound)
    return w, b


def init_params(key, hidden=HIDDEN):
    """f32 master params (nn.Linear-equivalent init)."""
    k1, k2, k3 = jax.random.split(key, 3)
    w1, b1 = _init_linear(k1, BERT_DIM, hidden)        # projection Linear(768, H)
    w2, b2 = _init_linear(k2, hidden, 2 * hidden)      # cond-aug Linear(H, 2H)
    w3, b3 = _init_linear(k3, 2 * hidden, hidden)      # cond-aug Linear(2H, H)
    return {"w1": w1, "b1": b1, "w2": w2, "b2": b2, "w3": w3, "b3": b3}


def prepare_params(params_f32):
    """One-time cast of matmul weights to bf16 (halves per-call HBM weight traffic).

    Biases stay f32 — they are added to the f32 accumulator.
    """
    out = dict(params_f32)
    for k in ("w1", "w2", "w3"):
        out[k] = params_f32[k].astype(jnp.bfloat16)
    return out


if __name__ == "__main__":
    key = jax.random.PRNGKey(0)
    k_feat, k_params = jax.random.split(key)

    # TODO(synk): BertTokenizer + frozen BertModel have no Pallas equivalent;
    # synthetic BERT last_hidden_state features stand in for bert(**tokens).
    B = 2
    word_embeddings = jax.random.normal(k_feat, (B, SEQ_LEN, BERT_DIM), jnp.float32)
    params_f32 = init_params(k_params)
    params = prepare_params(params_f32)     # done once, outside the hot path

    out = text_encoder_forward(word_embeddings, params)
    jax.block_until_ready(out)

    # Pure-JAX f32 reference check of the fused head (bf16 weights -> loosened tolerance).
    x = word_embeddings[:, 0, :]
    ref = jnp.maximum(x @ params_f32["w1"] + params_f32["b1"], 0.0)
    ref = jnp.maximum(ref @ params_f32["w2"] + params_f32["b2"], 0.0)
    ref = ref @ params_f32["w3"] + params_f32["b3"]

    assert out["sentence_embedding"].shape == (B, HIDDEN)
    assert out["sentence_embedding"].dtype == jnp.float32
    assert out["word_embeddings"].shape == (B, SEQ_LEN, BERT_DIM)
    assert jnp.allclose(out["sentence_embedding"], ref, atol=2e-2, rtol=2e-2)

    print("KERNEL_OK")
</pallas_src>

<mosaic_0001>
module attributes {stable_mosaic.version = 11 : i64} {
  func.func @_text_head_kernel(%arg0: i32, %arg1: memref<2x768xf32, #tpu.memory_space<vmem>>, %arg2: memref<768x128xbf16, #tpu.memory_space<vmem>>, %arg3: memref<1x128xf32, #tpu.memory_space<vmem>>, %arg4: memref<128x256xbf16, #tpu.memory_space<vmem>>, %arg5: memref<1x256xf32, #tpu.memory_space<vmem>>, %arg6: memref<256x128xbf16, #tpu.memory_space<vmem>>, %arg7: memref<1x128xf32, #tpu.memory_space<vmem>>, %arg8: memref<2x128xf32, #tpu.memory_space<vmem>>) attributes {dimension_semantics = [#tpu.dimension_semantics<parallel>], iteration_bounds = array<i64: 1>, scalar_prefetch = 0 : i64, scratch_operands = 0 : i64, tpu.core_type = #tpu.core_type<tc>, window_params = [{transform_indices = @transform_0, window_bounds = array<i64: 2, 768>}, {pipeline_mode = #tpu.pipeline_mode<synchronous>, transform_indices = @transform_1, window_bounds = array<i64: 768, 128>}, {pipeline_mode = #tpu.pipeline_mode<synchronous>, transform_indices = @transform_2, window_bounds = array<i64: 1, 128>}, {pipeline_mode = #tpu.pipeline_mode<synchronous>, transform_indices = @transform_3, window_bounds = array<i64: 128, 256>}, {pipeline_mode = #tpu.pipeline_mode<synchronous>, transform_indices = @transform_4, window_bounds = array<i64: 1, 256>}, {pipeline_mode = #tpu.pipeline_mode<synchronous>, transform_indices = @transform_5, window_bounds = array<i64: 256, 128>}, {pipeline_mode = #tpu.pipeline_mode<synchronous>, transform_indices = @transform_6, window_bounds = array<i64: 1, 128>}, {transform_indices = @transform_7, window_bounds = array<i64: 2, 128>}]} {
    %c0 = arith.constant 0 : index
    %c0_0 = arith.constant 0 : index
    %0 = vector.load %arg1[%c0, %c0_0] : memref<2x768xf32, #tpu.memory_space<vmem>>, vector<2x768xf32>
    %1 = arith.truncf %0 : vector<2x768xf32> to vector<2x768xbf16>
    %c0_1 = arith.constant 0 : index
    %c0_2 = arith.constant 0 : index
    %2 = vector.load %arg2[%c0_1, %c0_2] : memref<768x128xbf16, #tpu.memory_space<vmem>>, vector<768x128xbf16>
    %cst = arith.constant dense<0.000000e+00> : vector<2x128xf32>
    %3 = tpu.matmul %1, %2, %cst {dimension_numbers = #tpu.dot_dimension_numbers<[1], [0], [0], [1], [0, 0, 1, 1], [], []>} : vector<2x768xbf16>, vector<768x128xbf16>, vector<2x128xf32> -> vector<2x128xf32>
    %c0_3 = arith.constant 0 : index
    %c0_4 = arith.constant 0 : index
    %4 = vector.load %arg3[%c0_3, %c0_4] : memref<1x128xf32, #tpu.memory_space<vmem>>, vector<1x128xf32>
    %5 = vector.broadcast %4 : vector<1x128xf32> to vector<2x128xf32>
    %6 = arith.addf %3, %5 : vector<2x128xf32>
    %cst_5 = arith.constant 0.000000e+00 : f32
    %7 = vector.broadcast %cst_5 : f32 to vector<2x128xf32>
    %8 = arith.maximumf %6, %7 : vector<2x128xf32>
    %c0_6 = arith.constant 0 : index
    %c0_7 = arith.constant 0 : index
    %9 = vector.load %arg4[%c0_6, %c0_7] : memref<128x256xbf16, #tpu.memory_space<vmem>>, vector<128x256xbf16>
    %10 = arith.extf %9 : vector<128x256xbf16> to vector<128x256xf32>
    %cst_8 = arith.constant dense<0.000000e+00> : vector<2x256xf32>
    %11 = tpu.matmul %8, %10, %cst_8 {dimension_numbers = #tpu.dot_dimension_numbers<[1], [0], [0], [1], [0, 0, 1, 1], [], []>} : vector<2x128xf32>, vector<128x256xf32>, vector<2x256xf32> -> vector<2x256xf32>
    %c0_9 = arith.constant 0 : index
    %c0_10 = arith.constant 0 : index
    %12 = vector.load %arg5[%c0_9, %c0_10] : memref<1x256xf32, #tpu.memory_space<vmem>>, vector<1x256xf32>
    %13 = vector.broadcast %12 : vector<1x256xf32> to vector<2x256xf32>
    %14 = arith.addf %11, %13 : vector<2x256xf32>
    %cst_11 = arith.constant 0.000000e+00 : f32
    %15 = vector.broadcast %cst_11 : f32 to vector<2x256xf32>
    %16 = arith.maximumf %14, %15 : vector<2x256xf32>
    %c0_12 = arith.constant 0 : index
    %c0_13 = arith.constant 0 : index
    %17 = vector.load %arg6[%c0_12, %c0_13] : memref<256x128xbf16, #tpu.memory_space<vmem>>, vector<256x128xbf16>
    %18 = arith.extf %17 : vector<256x128xbf16> to vector<256x128xf32>
    %cst_14 = arith.constant dense<0.000000e+00> : vector<2x128xf32>
    %19 = tpu.matmul %16, %18, %cst_14 {dimension_numbers = #tpu.dot_dimension_numbers<[1], [0], [0], [1], [0, 0, 1, 1], [], []>} : vector<2x256xf32>, vector<256x128xf32>, vector<2x128xf32> -> vector<2x128xf32>
    %c0_15 = arith.constant 0 : index
    %c0_16 = arith.constant 0 : index
    %20 = vector.load %arg7[%c0_15, %c0_16] : memref<1x128xf32, #tpu.memory_space<vmem>>, vector<1x128xf32>
    %21 = vector.broadcast %20 : vector<1x128xf32> to vector<2x128xf32>
    %22 = arith.addf %19, %21 : vector<2x128xf32>
    %c0_17 = arith.constant 0 : index
    %c0_18 = arith.constant 0 : index
    %23 = vector.load %arg8[%c0_17, %c0_18] : memref<2x128xf32, #tpu.memory_space<vmem>>, vector<2x128xf32>
    tpu.vector_store %arg8[%c0_17, %c0_18], %22 {strides = array<i32>} : memref<2x128xf32, #tpu.memory_space<vmem>>, vector<2x128xf32>,
    return
  }
  func.func @transform_0(%arg0: i32) -> (i32, i32) {
    %c0_i32 = arith.constant 0 : i32
    %c0_i32_0 = arith.constant 0 : i32
    return %arg0, %c0_i32 : i32, i32
  }
  func.func @transform_1(%arg0: i32) -> (i32, i32) {
    %c0_i32 = arith.constant 0 : i32
    %c0_i32_0 = arith.constant 0 : i32
    %c0_i32_1 = arith.constant 0 : i32
    return %c0_i32, %c0_i32_0 : i32, i32
  }
  func.func @transform_2(%arg0: i32) -> (i32, i32) {
    %c0_i32 = arith.constant 0 : i32
    %c0_i32_0 = arith.constant 0 : i32
    %c0_i32_1 = arith.constant 0 : i32
    return %c0_i32, %c0_i32_0 : i32, i32
  }
  func.func @transform_3(%arg0: i32) -> (i32, i32) {
    %c0_i32 = arith.constant 0 : i32
    %c0_i32_0 = arith.constant 0 : i32
    %c0_i32_1 = arith.constant 0 : i32
    return %c0_i32, %c0_i32_0 : i32, i32
  }
  func.func @transform_4(%arg0: i32) -> (i32, i32) {
    %c0_i32 = arith.constant 0 : i32
    %c0_i32_0 = arith.constant 0 : i32
    %c0_i32_1 = arith.constant 0 : i32
    return %c0_i32, %c0_i32_0 : i32, i32
  }
  func.func @transform_5(%arg0: i32) -> (i32, i32) {
    %c0_i32 = arith.constant 0 : i32
    %c0_i32_0 = arith.constant 0 : i32
    %c0_i32_1 = arith.constant 0 : i32
    return %c0_i32, %c0_i32_0 : i32, i32
  }
  func.func @transform_6(%arg0: i32) -> (i32, i32) {
    %c0_i32 = arith.constant 0 : i32
    %c0_i32_0 = arith.constant 0 : i32
    %c0_i32_1 = arith.constant 0 : i32
    return %c0_i32, %c0_i32_0 : i32, i32
  }
  func.func @transform_7(%arg0: i32) -> (i32, i32) {
    %c0_i32 = arith.constant 0 : i32
    %c0_i32_0 = arith.constant 0 : i32
    return %arg0, %c0_i32 : i32, i32
  }
}

</mosaic_0001>

<bundles_post_ra>
// kernel: text_encoder_forward.1
= control target key start
LH: loop header
LB: loop body
LE: loop exit
PB: predicated region body
PF: predicated region fallthrough
CT: control target
= control target key end

     0   :  { %s1387_s0 = inlined_call_operand.vmem [shape: f32[2,49152], index: 0, kind: input, shape index: {}]   ;;  %s1388_s1 = inlined_call_operand.vmem [shape: bf16[768,128], index: 1, kind: input, shape index: {}]   ;;  %s1389_s2 = inlined_call_operand.vmem [shape: f32[1,128], index: 2, kind: input, shape index: {}]   ;;  %s1390_s3 = inlined_call_operand.vmem [shape: bf16[128,256], index: 3, kind: input, shape index: {}]   ;;  %s1391_s4 = inlined_call_operand.vmem [shape: f32[1,256], index: 4, kind: input, shape index: {}]   ;;  %s1392_s5 = inlined_call_operand.vmem [shape: bf16[256,128], index: 5, kind: input, shape index: {}]   ;;  %s1393_s6 = inlined_call_operand.vmem [shape: f32[1,128], index: 6, kind: input, shape index: {}]   ;;  %s1394_s7 = inlined_call_operand.hbm [shape: f32[2,128], index: 7, kind: output, shape index: {}]  }
   0x1   :  { %v939_v0 = vld [vmem:[%s1388_s1 + $0x38] sm:$0xff]  ;;  %v938_v2 = vld [vmem:[%s1388_s1 + $0x30] sm:$0xff]  ;;  %v937_v8 = vld [vmem:[%s1388_s1 + $0x28] sm:$0xff] }
   0x2   :  { %v947_v1 = vld [vmem:[%s1388_s1 + $0x78] sm:$0xff]  ;;  %440 = vmatpush.bf16.msra.mxu0 %v939_v0  ;;  %v946_v3 = vld [vmem:[%s1388_s1 + $0x70] sm:$0xff]  ;;  %v945_v9 = vld [vmem:[%s1388_s1 + $0x68] sm:$0xff] }
   0x3   :  { %453 = vmatpush.bf16.msra.mxu1 %v947_v1  ;;  %v955_v4 = vld [vmem:[%s1388_s1 + $0xb8] sm:$0xff]  ;;  %v954_v6 = vld [vmem:[%s1388_s1 + $0xb0] sm:$0xff]  ;;  %v953_v10 = vld [vmem:[%s1388_s1 + $0xa8] sm:$0xff] }
   0x4   :  { %v963_v5 = vld [vmem:[%s1388_s1 + $0xf8] sm:$0xff]  ;;  %466 = vmatpush.bf16.msra.mxu2 %v955_v4  ;;  %v962_v7 = vld [vmem:[%s1388_s1 + $0xf0] sm:$0xff]  ;;  %v961_v11 = vld [vmem:[%s1388_s1 + $0xe8] sm:$0xff] }
   0x5   :  { %479 = vmatpush.bf16.msra.mxu3 %v963_v5  ;;  %v936_v12 = vld [vmem:[%s1388_s1 + $0x20] sm:$0xff]  ;;  %v935_v16 = vld [vmem:[%s1388_s1 + $0x18] sm:$0xff] }
   0x6   :  { %441 = vmatpush.bf16.msra.mxu0 %v938_v2  ;;  %v944_v13 = vld [vmem:[%s1388_s1 + $0x60] sm:$0xff]  ;;  %v943_v18 = vld [vmem:[%s1388_s1 + $0x58] sm:$0xff] }
   0x7   :  { %454 = vmatpush.bf16.msra.mxu1 %v946_v3  ;;  %v27_v14 = vld [vmem:[%s1387_s0] sm:$0xff] }
   0x8   :  { %467 = vmatpush.bf16.msra.mxu2 %v954_v6  ;;  %v952_v15 = vld [vmem:[%s1388_s1 + $0xa0] sm:$0xff]  ;;  %31 = vst [vmem:[#allocation1] ss:$4 sm:$0xff] %v27_v14 }
   0x9   :  { %480 = vmatpush.bf16.msra.mxu3 %v962_v7  ;;  %v960_v17 = vld [vmem:[%s1388_s1 + $0xe0] sm:$0xff] }
   0xa   :  { %442 = vmatpush.bf16.msra.mxu0 %v937_v8 }
   0xb   :  { %455 = vmatpush.bf16.msra.mxu1 %v945_v9 }
   0xc   :  { %468 = vmatpush.bf16.msra.mxu2 %v953_v10 }
   0xd   :  { %481 = vmatpush.bf16.msra.mxu3 %v961_v11 }
   0xe   :  { %443 = vmatpush.bf16.msra.mxu0 %v936_v12 }
   0xf   :  { %456 = vmatpush.bf16.msra.mxu1 %v944_v13 }
  0x10   :  { %12 = vsyncpa [#allocation3], 0  ;;  %469 = vmatpush.bf16.msra.mxu2 %v952_v15  ;;  %v951_v19 = vld [vmem:[%s1388_s1 + $0x98] sm:$0xff]  ;;  %v934_v21 = vld [vmem:[%s1388_s1 + $0x10] sm:$0xff]  ;;  %s1088_s21 = smov [#allocation2]  }
  0x11   :  { %482 = vmatpush.bf16.msra.mxu3 %v960_v17  ;;  %v959_v20 = vld [vmem:[%s1388_s1 + $0xd8] sm:$0xff]  ;;  %v942_v22 = vld [vmem:[%s1388_s1 + $0x50] sm:$0xff]  ;;  %v28_v25 = vld [vmem:[%s1387_s0 + $0x8] sm:$0xf]  ;;  %s729_s22 = sshll.u32 %s1088_s21, 4  ;;  %s730_s22 = int_to_ptr.vmem [resolvable:$true] %s729_s22 }
  0x12   :  { %444 = vmatpush.bf16.msra.mxu0 %v935_v16  ;;  %v950_v23 = vld [vmem:[%s1388_s1 + $0x90] sm:$0xff]  ;;  %v933_v26 = vld [vmem:[%s1388_s1 + $0x8] sm:$0xff]  ;;  %33 = vst [vmem:[#allocation1 + $0x20] ss:$4 sm:$0xff] %v28_v25  ;;  %v932_v29 = vld [vmem:[%s1388_s1] sm:$0xff] }
  0x13   :  { %457 = vmatpush.bf16.msra.mxu1 %v943_v18  ;;  %v958_v24 = vld [vmem:[%s1388_s1 + $0xd0] sm:$0xff]  ;;  %v941_v27 = vld [vmem:[%s1388_s1 + $0x48] sm:$0xff]  ;;  %v940_v30 = vld [vmem:[%s1388_s1 + $0x40] sm:$0xff] }
  0x14   :  { %470 = vmatpush.bf16.msra.mxu2 %v951_v19  ;;  %v949_v28 = vld [vmem:[%s1388_s1 + $0x88] sm:$0xff]  ;;  %v34_v32 = vld.sshfl [vmem:[#allocation1] sm:$0xff pattern:$0x73625140]  ;;  %v971_v34 = vld [vmem:[%s1388_s1 + $0x138] sm:$0xff] }
  0x15   :  { %483 = vmatpush.bf16.msra.mxu3 %v959_v20  ;;  %v957_v31 = vld [vmem:[%s1388_s1 + $0xc8] sm:$0xff]  ;;  %v979_v35 = vld [vmem:[%s1388_s1 + $0x178] sm:$0xff]  ;;  %v948_v36 = vld [vmem:[%s1388_s1 + $0x80] sm:$0xff]  ;;  %v46_v37 = vpack.c.bf16 %v34_v32, %v34_v32 }
  0x16   :  { %445 = vmatpush.bf16.msra.mxu0 %v934_v21  ;;  %v35_v33 = vld.sshfl [vmem:[#allocation1 + $0x8] sm:$0xff pattern:$0x73625140]  ;;  %v36_v39 = vld.sshfl [vmem:[#allocation1 + $0x10] sm:$0xff pattern:$0x73625140] }
  0x17   :  { %458 = vmatpush.bf16.msra.mxu1 %v942_v22  ;;  %v47_v38 = vpack.c.bf16 %v35_v33, %v35_v33  ;;  %v956_v40 = vld [vmem:[%s1388_s1 + $0xc0] sm:$0xff]  ;;  %v37_v41 = vld.sshfl [vmem:[#allocation1 + $0x18] sm:$0xff pattern:$0x73625140]  ;;  %v970_v42 = vld [vmem:[%s1388_s1 + $0x130] sm:$0xff]  ;;  %v48_v44 = vpack.c.bf16 %v36_v39, %v36_v39 }
  0x18   :  { %471 = vmatpush.bf16.msra.mxu2 %v950_v23  ;;  %v978_v43 = vld [vmem:[%s1388_s1 + $0x170] sm:$0xff]  ;;  %v49_v45 = vpack.c.bf16 %v37_v41, %v37_v41  ;;  %v969_v46 = vld [vmem:[%s1388_s1 + $0x128] sm:$0xff]  ;;  %v968_v48 = vld [vmem:[%s1388_s1 + $0x120] sm:$0xff] }
  0x19   :  { %484 = vmatpush.bf16.msra.mxu3 %v958_v24  ;;  %v977_v47 = vld [vmem:[%s1388_s1 + $0x168] sm:$0xff]  ;;  %v976_v49 = vld [vmem:[%s1388_s1 + $0x160] sm:$0xff]  ;;  %v967_v50 = vld [vmem:[%s1388_s1 + $0x118] sm:$0xff] }
  0x1a   :  { %446 = vmatpush.bf16.msra.mxu0 %v933_v26  ;;  %v975_v51 = vld [vmem:[%s1388_s1 + $0x158] sm:$0xff]  ;;  %v966_v52 = vld [vmem:[%s1388_s1 + $0x110] sm:$0xff]  ;;  %v965_v54 = vld [vmem:[%s1388_s1 + $0x108] sm:$0xff] }
  0x1b   :  { %459 = vmatpush.bf16.msra.mxu1 %v941_v27  ;;  %v974_v53 = vld [vmem:[%s1388_s1 + $0x150] sm:$0xff]  ;;  %v973_v55 = vld [vmem:[%s1388_s1 + $0x148] sm:$0xff]  ;;  %v964_v56 = vld [vmem:[%s1388_s1 + $0x100] sm:$0xff] }
  0x1c   :  { %472 = vmatpush.bf16.msra.mxu2 %v949_v28  ;;  %v972_v57 = vld [vmem:[%s1388_s1 + $0x140] sm:$0xff]  ;;  %v39_v59 = vld.sshfl [vmem:[#allocation1 + $0x28] sm:$0xff pattern:$0x73625140]  ;;  %v534_v62 = vld [vmem:[%s1390_s3 + $0x78] sm:$0xff] }
  0x1d   :  { %485 = vmatpush.bf16.msra.mxu3 %v957_v31  ;;  %v38_v58 = vld.sshfl [vmem:[#allocation1 + $0x20] sm:$0xff pattern:$0x73625140]  ;;  %v51_v61 = vpack.c.bf16 %v39_v59, %v39_v59  ;;  %v565_v63 = vunpack.c.l.bf16 %v534_v62  ;;  %v566_v0 = vunpack.c.h.bf16 %v534_v62  ;;  %v533_v1 = vld [vmem:[%s1390_s3 + $0x70] sm:$0xff]  ;;  %v532_v2 = vld [vmem:[%s1390_s3 + $0x68] sm:$0xff] }
  0x1e   :  { %447 = vmatpush.bf16.msra.mxu0 %v932_v29  ;;  %v50_v60 = vpack.c.bf16 %v38_v58, %v38_v58  ;;  %v531_v3 = vld [vmem:[%s1390_s3 + $0x60] sm:$0xff]  ;;  %v563_v4 = vunpack.c.l.bf16 %v533_v1  ;;  %v564_v5 = vunpack.c.h.bf16 %v533_v1  ;;  %v561_v6 = vunpack.c.l.bf16 %v532_v2  ;;  %v530_v10 = vld [vmem:[%s1390_s3 + $0x58] sm:$0xff]  ;;  %v529_v11 = vld [vmem:[%s1390_s3 + $0x50] sm:$0xff] }
  0x1f   :  { %460 = vmatpush.bf16.msra.mxu1 %v940_v30  ;;  %v562_v7 = vunpack.c.h.bf16 %v532_v2  ;;  %v559_v8 = vunpack.c.l.bf16 %v531_v3  ;;  %v560_v9 = vunpack.c.h.bf16 %v531_v3  ;;  %v557_v12 = vunpack.c.l.bf16 %v530_v10  ;;  %v528_v16 = vld [vmem:[%s1390_s3 + $0x48] sm:$0xff]  ;;  %v527_v19 = vld [vmem:[%s1390_s3 + $0x40] sm:$0xff]  ;;  %v526_v20 = vld [vmem:[%s1390_s3 + $0x38] sm:$0xff] }
  0x20   :  { %473 = vmatpush.bf16.msra.mxu2 %v948_v36  ;;  %v558_v13 = vunpack.c.h.bf16 %v530_v10  ;;  %v555_v14 = vunpack.c.l.bf16 %v529_v11  ;;  %v556_v15 = vunpack.c.h.bf16 %v529_v11  ;;  %v553_v17 = vunpack.c.l.bf16 %v528_v16  ;;  %v525_v23 = vld [vmem:[%s1390_s3 + $0x30] sm:$0xff]  ;;  %v524_v26 = vld [vmem:[%s1390_s3 + $0x28] sm:$0xff]  ;;  %v523_v29 = vld [vmem:[%s1390_s3 + $0x20] sm:$0xff] }
  0x21   :  { %448 = vmatmul.bf16.vlgmr.msra.gmra.mxu0 %v46_v37  ;;  %486 = vmatpush.bf16.msra.mxu3 %v956_v40  ;;  %v554_v18 = vunpack.c.h.bf16 %v528_v16  ;;  %v551_v21 = vunpack.c.l.bf16 %v527_v19  ;;  %v552_v22 = vunpack.c.h.bf16 %v527_v19  ;;  %v549_v24 = vunpack.c.l.bf16 %v526_v20  ;;  %v521_v37 = vld [vmem:[%s1390_s3 + $0x10] sm:$0xff]  ;;  %v520_v40 = vld [vmem:[%s1390_s3 + $0x8] sm:$0xff]  ;;  %v1060_v2 = vld [vmem:[%s1389_s2] ss:$0 sm:$0xff] }
  0x22   :  { %492 = vmatpush.bf16.msrb.mxu0 %v971_v34  ;;  %461 = vmatmul.bf16.vlgmr.msra.gmra.mxu1 %v47_v38  ;;  %v550_v25 = vunpack.c.h.bf16 %v526_v20  ;;  %v547_v27 = vunpack.c.l.bf16 %v525_v23  ;;  %v548_v28 = vunpack.c.h.bf16 %v525_v23  ;;  %v545_v30 = vunpack.c.l.bf16 %v524_v26  ;;  %v522_v34 = vld [vmem:[%s1390_s3 + $0x18] sm:$0xff]  ;;  %v1056_v62 = vld [vmem:[%s1392_s5 + $0x68] sm:$0xff]  }
  0x23   :  { %505 = vmatpush.bf16.msrb.mxu1 %v979_v35  ;;  %474 = vmatmul.bf16.vlgmr.msra.gmra.mxu2 %v48_v44  ;;  %v546_v31 = vunpack.c.h.bf16 %v524_v26  ;;  %v543_v32 = vunpack.c.l.bf16 %v523_v29  ;;  %v544_v33 = vunpack.c.h.bf16 %v523_v29  ;;  %v541_v35 = vunpack.c.l.bf16 %v522_v34  ;;  %v1052_v29 = vld [vmem:[%s1392_s5 + $0x48] sm:$0xff]  }
  0x24   :  { %487 = vmatmul.bf16.vlgmr.msra.gmra.mxu3 %v49_v45  ;;  %573 = vmatpush.msrb.mxu2 %v565_v63  ;;  %v542_v36 = vunpack.c.h.bf16 %v522_v34  ;;  %v539_v38 = vunpack.c.l.bf16 %v521_v37  ;;  %v540_v39 = vunpack.c.h.bf16 %v521_v37  ;;  %v537_v41 = vunpack.c.l.bf16 %v520_v40  ;;  %v519_v45 = vld [vmem:[%s1390_s3] sm:$0xff] }
  0x25   :  { %593 = vmatpush.msrb.mxu3 %v566_v0  ;;  %v1019_v34 = vunpack.c.h.bf16 %v1052_v29 }
  0x26   :  { %493 = vmatpush.bf16.msrb.mxu0 %v970_v42  ;;  %574 = vmatpush.msrb.mxu2 %v563_v4  ;;  %v538_v42 = vunpack.c.h.bf16 %v520_v40  ;;  %v1035_v4 = vunpack.c.h.bf16 %v1056_v62 }
  0x27   :  { %506 = vmatpush.bf16.msrb.mxu1 %v978_v43  ;;  %594 = vmatpush.msrb.mxu3 %v564_v5  ;;  %v1047_v5 = vld [vmem:[%s1392_s5 + $0x20] sm:$0xff]  }
  0x28   :  { %575 = vmatpush.msrb.mxu2 %v561_v6  ;;  %v1055_v6 = vld [vmem:[%s1392_s5 + $0x60] sm:$0xff]   ;;  %v999_v10 = vunpack.c.h.bf16 %v1047_v5  ;;  %v998_v16 = vunpack.c.l.bf16 %v1047_v5 }
  0x29   :  { %595 = vmatpush.msrb.mxu3 %v562_v7  ;;  %v1031_v11 = vunpack.c.h.bf16 %v1055_v6 }
  0x2a   :  { %494 = vmatpush.bf16.msrb.mxu0 %v969_v46  ;;  %576 = vmatpush.msrb.mxu2 %v559_v8  ;;  %v535_v46 = vunpack.c.l.bf16 %v519_v45  ;;  %v1034_v8 = vunpack.c.l.bf16 %v1056_v62 }
  0x2b   :  { %507 = vmatpush.bf16.msrb.mxu1 %v977_v47  ;;  %596 = vmatpush.msrb.mxu3 %v560_v9  ;;  %v536_v47 = vunpack.c.h.bf16 %v519_v45  ;;  %v1051_v45 = vld [vmem:[%s1392_s5 + $0x40] sm:$0xff]  }
  0x2c   :  { %577 = vmatpush.msrb.mxu2 %v557_v12 }
  0x2d   :  { %597 = vmatpush.msrb.mxu3 %v558_v13  ;;  %v1046_v13 = vld [vmem:[%s1392_s5 + $0x18] sm:$0xff]  }
  0x2e   :  { %495 = vmatpush.bf16.msrb.mxu0 %v968_v48  ;;  %578 = vmatpush.msrb.mxu2 %v555_v14  ;;  %v1050_v48 = vld [vmem:[%s1392_s5 + $0x38] sm:$0xff]   ;;  %v995_v19 = vunpack.c.h.bf16 %v1046_v13  ;;  %v994_v23 = vunpack.c.l.bf16 %v1046_v13 }
  0x2f   :  { %508 = vmatpush.bf16.msrb.mxu1 %v976_v49  ;;  %598 = vmatpush.msrb.mxu3 %v556_v15  ;;  %v1058_v49 = vld [vmem:[%s1392_s5 + $0x78] sm:$0xff]  }
  0x30   :  { %579 = vmatpush.msrb.mxu2 %v553_v17  ;;  %v1054_v14 = vld [vmem:[%s1392_s5 + $0x58] sm:$0xff]   ;;  %v1030_v17 = vunpack.c.l.bf16 %v1055_v6 }
  0x31   :  { %599 = vmatpush.msrb.mxu3 %v554_v18  ;;  %v1027_v20 = vunpack.c.h.bf16 %v1054_v14 }
  0x32   :  { %496 = vmatpush.bf16.msrb.mxu0 %v967_v50  ;;  %580 = vmatpush.msrb.mxu2 %v551_v21  ;;  %v1049_v50 = vld [vmem:[%s1392_s5 + $0x30] sm:$0xff]  }
  0x33   :  { %509 = vmatpush.bf16.msrb.mxu1 %v975_v51  ;;  %600 = vmatpush.msrb.mxu3 %v552_v22  ;;  %v1011_v51 = vunpack.c.h.bf16 %v1050_v48  ;;  %v1007_v58 = vunpack.c.h.bf16 %v1049_v50  ;;  %v1006_v0 = vunpack.c.l.bf16 %v1049_v50  ;;  %v1045_v21 = vld [vmem:[%s1392_s5 + $0x10] sm:$0xff]   ;;  %v567_v50 = vld [vmem:[%s1391_s4] sm:$0x3]  ;;  %s731_s4 = sshll.u32 %s1394_s7, 4  ;;  %s732_s4 = int_to_ptr.hbm [resolvable:$true] %s731_s4 }
  0x34   :  { %581 = vmatpush.msrb.mxu2 %v549_v24  ;;  %v1053_v22 = vld [vmem:[%s1392_s5 + $0x50] sm:$0xff]   ;;  %v1026_v24 = vunpack.c.l.bf16 %v1054_v14  ;;  %v991_v26 = vunpack.c.h.bf16 %v1045_v21 }
  0x35   :  { %601 = vmatpush.msrb.mxu3 %v550_v25 }
  0x36   :  { %497 = vmatpush.bf16.msrb.mxu0 %v966_v52  ;;  %582 = vmatpush.msrb.mxu2 %v547_v27  ;;  %v1043_v52 = vunpack.c.h.bf16 %v1058_v49  ;;  %v1023_v27 = vunpack.c.h.bf16 %v1053_v22 }
  0x37   :  { %510 = vmatpush.bf16.msrb.mxu1 %v974_v53  ;;  %602 = vmatpush.msrb.mxu3 %v548_v28  ;;  %v1010_v53 = vunpack.c.l.bf16 %v1050_v48  ;;  %v1044_v28 = vld [vmem:[%s1392_s5 + $0x8] sm:$0xff]  }
  0x38   :  { %583 = vmatpush.msrb.mxu2 %v545_v30  ;;  %v990_v30 = vunpack.c.l.bf16 %v1045_v21 }
  0x39   :  { %603 = vmatpush.msrb.mxu3 %v546_v31  ;;  %v1022_v31 = vunpack.c.l.bf16 %v1053_v22 }
  0x3a   :  { %498 = vmatpush.bf16.msrb.mxu0 %v965_v54  ;;  %584 = vmatpush.msrb.mxu2 %v543_v32  ;;  %v1042_v54 = vunpack.c.l.bf16 %v1058_v49  ;;  %v1014_v49 = vunpack.c.l.bf16 %v1051_v45 }
  0x3b   :  { %511 = vmatpush.bf16.msrb.mxu1 %v973_v55  ;;  %604 = vmatpush.msrb.mxu3 %v544_v33  ;;  %v1057_v55 = vld [vmem:[%s1392_s5 + $0x70] sm:$0xff]   ;;  %v987_v33 = vunpack.c.h.bf16 %v1044_v28 }
  0x3c   :  { %585 = vmatpush.msrb.mxu2 %v541_v35  ;;  %v1039_v59 = vunpack.c.h.bf16 %v1057_v55  ;;  %v1038_v1 = vunpack.c.l.bf16 %v1057_v55 }
  0x3d   :  { %605 = vmatpush.msrb.mxu3 %v542_v36 }
  0x3e   :  { %499 = vmatpush.bf16.msrb.mxu0 %v964_v56  ;;  %586 = vmatpush.msrb.mxu2 %v539_v38 }
  0x3f   :  { %512 = vmatpush.bf16.msrb.mxu1 %v972_v57  ;;  %606 = vmatpush.msrb.mxu3 %v540_v39 }
  0x40   :  { %587 = vmatpush.msrb.mxu2 %v537_v41 }
  0x41   :  { %500 = vmatmul.bf16.vlgmr.msrb.gmra.mxu0 %v50_v60  ;;  %607 = vmatpush.msrb.mxu3 %v538_v42  ;;  %v986_v42 = vunpack.c.l.bf16 %v1044_v28 }
  0x42   :  { %513 = vmatmul.bf16.vlgmr.msrb.gmra.mxu1 %v51_v61  ;;  %588 = vmatpush.msrb.mxu2 %v535_v46  ;;  %v1048_v61 = vld [vmem:[%s1392_s5 + $0x28] sm:$0xff]  }
  0x43   :  { %608 = vmatpush.msrb.mxu3 %v536_v47  ;;  %683 = vmatpush.msra.mxu0 %v1011_v51  ;;  %v1003_v3 = vunpack.c.h.bf16 %v1048_v61  ;;  %v1002_v7 = vunpack.c.l.bf16 %v1048_v61  ;;  %v1015_v47 = vunpack.c.h.bf16 %v1051_v45  ;;  %v569_v51 = vperm.slane %v567_v50, 0 }
  0x44   :  { %703 = vmatpush.msra.mxu1 %v1043_v52  ;;  %v570_v52 = vperm.slane %v567_v50, 1 }
  0x45   :  { %684 = vmatpush.msra.mxu0 %v1010_v53 }
  0x46   :  { %704 = vmatpush.msra.mxu1 %v1042_v54 }
  0x47   :  { %685 = vmatpush.msra.mxu0 %v1007_v58 }
  0x48   :  { %705 = vmatpush.msra.mxu1 %v1039_v59  ;;  %v1061_v59 = vld [vmem:[%s1393_s6] ss:$0 sm:$0xff] }
  0x49   :  { %686 = vmatpush.msra.mxu0 %v1006_v0 }
  0x4a   :  { %706 = vmatpush.msra.mxu1 %v1038_v1 }
  0x4b   :  { %687 = vmatpush.msra.mxu0 %v1003_v3 }
  0x4c   :  { %707 = vmatpush.msra.mxu1 %v1035_v4 }
  0x4d   :  { %688 = vmatpush.msra.mxu0 %v1002_v7 }
  0x4e   :  { %708 = vmatpush.msra.mxu1 %v1034_v8 }
  0x4f   :  { %689 = vmatpush.msra.mxu0 %v999_v10 }
  0x50   :  { %709 = vmatpush.msra.mxu1 %v1031_v11 }
  0x51   :  { %690 = vmatpush.msra.mxu0 %v998_v16 }
  0x52   :  { %710 = vmatpush.msra.mxu1 %v1030_v17 }
  0x53   :  { %691 = vmatpush.msra.mxu0 %v995_v19 }
  0x54   :  { %711 = vmatpush.msra.mxu1 %v1027_v20 }
  0x55   :  { %692 = vmatpush.msra.mxu0 %v994_v23 }
  0x56   :  { %712 = vmatpush.msra.mxu1 %v1026_v24 }
  0x57   :  { %693 = vmatpush.msra.mxu0 %v991_v26 }
  0x58   :  { %713 = vmatpush.msra.mxu1 %v1023_v27 }
  0x59   :  { %694 = vmatpush.msra.mxu0 %v990_v30 }
  0x5a   :  { %714 = vmatpush.msra.mxu1 %v1022_v31 }
  0x5b   :  { %695 = vmatpush.msra.mxu0 %v987_v33 }
  0x5c   :  { %715 = vmatpush.msra.mxu1 %v1019_v34 }
  0x5d   :  { %696 = vmatpush.msra.mxu0 %v986_v42 }
  0x9e   :  { %v449_v43 = vpop.f32.mrf.mxu0 }
  0x9f   :  { %v462_v44 = vpop.f32.mrf.mxu1  ;;  %v450_v9 = vadd.f32 %v1060_v2, %v449_v43  ;;  %v1018_v43 = vunpack.c.l.bf16 %v1052_v29 }
  0xa1   :  { %v463_v18 = vadd.f32 %v462_v44, %v450_v9  ;;  %v981_v44 = vld [vmem:[%s1392_s5] sm:$0xff]   ;;  %716 = vmatpush.msra.mxu1 %v1018_v43 }
  0xa2   :  { %v983_v46 = vunpack.c.h.bf16 %v981_v44  ;;  %v982_v48 = vunpack.c.l.bf16 %v981_v44 }
  0xa3   :  { %717 = vmatpush.msra.mxu1 %v1015_v47 }
  0xa4   :  { %697 = vmatpush.msra.mxu0 %v983_v46 }
  0xa5   :  { %718 = vmatpush.msra.mxu1 %v1014_v49 }
  0xa6   :  { %v451_v56 = vpop.f32.mrf.mxu0  ;;  %v475_v60 = vpop.f32.mrf.mxu2  ;;  %698 = vmatpush.msra.mxu0 %v982_v48 }
  0xa7   :  { %v464_v57 = vpop.f32.mrf.mxu1  ;;  %v488_v63 = vpop.f32.mrf.mxu3  ;;  %v476_v25 = vadd.f32 %v475_v60, %v463_v18 }
  0xa9   :  { %v489_v32 = vadd.f32 %v488_v63, %v476_v25 }
  0xae   :  { %v477_v12 = vpop.f32.mrf.mxu2 }
  0xaf   :  { %v490_v15 = vpop.f32.mrf.mxu3 }
  0xbe   :  { %v501_v35 = vpop.f32.mrf.mxu0 }
  0xbf   :  { %v514_v36 = vpop.f32.mrf.mxu1  ;;  %v502_v37 = vadd.f32 %v501_v35, %v489_v32 }
  0xc1   :  { %v515_v38 = vadd.f32 %v514_v36, %v502_v37 }
  0xc3   :  { %v518_v39 = vmax.f32 %v515_v38, 0.0 }
  0xc5   :  { %589 = vmatmul.f32.vlgmr.msrb.gmra.mxu2 %v518_v39  ;;  %609 = vmatmul.f32.vlgmr.msrb.gmra.mxu3 %v518_v39 }
  0xc6   :  { %v503_v40 = vpop.f32.mrf.mxu0 }
  0xc7   :  { %v516_v41 = vpop.f32.mrf.mxu1 }
 0x148   :  { %v590_v53 = vpop.f32.mrf.mxu2  ;;  %v610_v54 = vpop.f32.mrf.mxu3 }
 0x149   :  { %v591_v55 = vadd.f32 %v590_v53, %v569_v51  ;;  %v611_v56 = vadd.f32 %v610_v54, %v570_v52 }
 0x14b   :  { %v613_v57 = vmax.f32 %v591_v55, 0.0  ;;  %v614_v58 = vmax.f32 %v611_v56, 0.0 }
 0x14d   :  { %699 = vmatmul.f32.vlgmr.msra.gmra.mxu0 %v613_v57  ;;  %719 = vmatmul.f32.vlgmr.msra.gmra.mxu1 %v614_v58 }
 0x1ca   :  { %v700_v60 = vpop.f32.mrf.mxu0  ;;  %v720_v62 = vpop.f32.mrf.mxu1 }
 0x1cb   :  { %v701_v61 = vadd.f32 %v1061_v59, %v700_v60 }
 0x1cd   :  { %v721_v63 = vadd.f32 %v720_v62, %v701_v61 }
 0x1cf   :  { %723 = vst [vmem:[#allocation2] sm:$0x3] %v721_v63 }
 0x1d0   :  { %734 = dma.vmem_to_hbm [thread:$0]  %s730_s22, 32, %s732_s4, [#allocation3]  }
 0x1d1   :  { %1086 = dma.done.wait [#allocation3], 32  }
 0x1d2   :  { %1087 = vsyncadd [#allocation3], 4294967264 }
 0x1d3   :  { %739 = vsyncpa [#allocation3], 1 }

</bundles_post_ra>
